<compile_context>
chip_gen: v7x
topology: tpu7x:2x2x1
jax: 0.10.0
libtpu: 0.0.40
codegen_flags: <defaults>
</compile_context>

<pallas_src>
import functools
import math

import numpy as np
import jax
import jax.numpy as jnp
from jax import lax
from jax.experimental import pallas as pl
from jax.experimental.pallas import tpu as pltpu

LN_EPS = 1e-5
MIB = 1024 * 1024

_VARIANT_CACHE = {}        # config key -> bool (lane-dense output supported)
_LAST_PROBE_ERROR = None   # last Mosaic error seen by the lane-dense probe


def _round_up(n, m):
    return ((n + m - 1) // m) * m


def patch_expand_kernel(x_ref, w_ref, sdown_ref, sup_ref, g_ref, b_ref, o_ref, *,
                        lane_dense):
    # x_ref      : (tm, dim)        tm = th * W tokens of x
    # w_ref      : (dim, 2*dim)     expand weight (pre-transposed Linear weight)
    # sdown_ref  : (2*dim, 4)       per-chunk averaging matrix (1/c entries)
    # sup_ref    : (4, 2*dim)       chunk -> full-width broadcast matrix (0/1)
    # g_ref/b_ref: (1, 2*dim)       LayerNorm gamma/beta tiled over the 4 chunks
    # o_ref      : (th, 2*W*dim)    lane-dense fused-rearrange output block, or
    #              (th, 2, W, dim)  safe fallback layout
    dim = x_ref.shape[1]

    # Expansion matmul on the MXU, f32 accumulation.
    y = jnp.dot(x_ref[...], w_ref[...], preferred_element_type=jnp.float32)

    # Per-chunk (chunk = dim//2 lanes) LayerNorm statistics via tiny matmuls;
    # rsqrt is evaluated at chunk width (tm, 4) before the broadcast.
    mu4 = jnp.dot(y, sdown_ref[...], preferred_element_type=jnp.float32)
    ms4 = jnp.dot(y * y, sdown_ref[...], preferred_element_type=jnp.float32)
    var4 = jnp.maximum(ms4 - mu4 * mu4, 0.0)
    r4 = lax.rsqrt(var4 + LN_EPS)

    mu = jnp.dot(mu4, sup_ref[...], preferred_element_type=jnp.float32)
    r = jnp.dot(r4, sup_ref[...], preferred_element_type=jnp.float32)
    out = (y - mu) * r * g_ref[...] + b_ref[...]          # (tm, 2*dim), f32

    # Fused 'B h w (p1 p2 c) -> B (h p1) (w p2) c': channel-half p1 of source
    # token (hr, w) becomes output row (hr, p1), lane range [w*dim, (w+1)*dim).
    # Two direct stores; no concatenate temp.
    if lane_dense:
        th, row_w = o_ref.shape
        half = row_w // 2                                  # = W * dim
        o_ref[:, :half] = out[:, :dim].reshape(th, half).astype(o_ref.dtype)
        o_ref[:, half:] = out[:, dim:].reshape(th, half).astype(o_ref.dtype)
    else:
        th, _, W, d = o_ref.shape
        o_ref[:, 0:1] = out[:, :dim].reshape(th, 1, W, d).astype(o_ref.dtype)
        o_ref[:, 1:2] = out[:, dim:].reshape(th, 1, W, d).astype(o_ref.dtype)


def _vmem_capacity_bytes():
    try:
        cap = getattr(pltpu.get_tpu_info(), "vmem_capacity_bytes", None)
        if cap:
            return int(cap)
    except Exception:  # non-TPU backend / older jax: be conservative (v7x size)
        pass
    return 64 * MIB


def _vmem_policy(vmem_limit_bytes):
    """Generation-aware scoped-VMEM limit and tile-pick budget."""
    cap = _vmem_capacity_bytes()
    if vmem_limit_bytes is None:
        # ~40 MiB on v7x (64 MiB per TC), ~96 MiB on v5e/v6e (128 MiB).
        vmem_limit_bytes = min((3 * cap) // 4, max(cap - 24 * MIB, cap // 2))
    budget = max(4 * MIB, (2 * vmem_limit_bytes) // 5)   # ~16 MiB v7x, ~38 MiB v6e
    return int(vmem_limit_bytes), int(budget)


def _th_alignment(W, in_itemsize, out_itemsize):
    """Sublane alignment required for th (output rows) and th*W (x rows)."""
    req_in = 32 // in_itemsize        # 8 (f32) / 16 (bf16) / 32 (int8) rows
    req_out = 32 // out_itemsize
    g_in = req_in // math.gcd(W, req_in)   # th % g_in == 0 => (th*W) % req_in == 0
    return (req_out * g_in) // math.gcd(req_out, g_in)


def _pick_th(BH, W, dim, in_bytes, out_bytes, th_align, budget_bytes,
             tile_rows=None, max_rows=4096, target_steps=8):
    """Pick th = H-rows per tile (tm = th*W token rows per grid step)."""
    two_dim = 2 * dim
    if tile_rows is None:
        pad_d = _round_up(dim, 128)
        pad_2d = _round_up(two_dim, 128)
        # Per token row: x block (2 pipeline buffers, lane-padded) + output
        # (2*dim elems/token, 2 buffers, lane-padded) + ~8 full-width f32 temps
        # (y, y*y, mu, r, normalized out, fold/relayout copies).
        per_row = (2 * pad_d * in_bytes
                   + 2 * 2 * pad_d * out_bytes
                   + 8 * pad_2d * 4)
        # Constants (double-buffered): expand weight + sdown/sup/gamma/beta,
        # plus slack for Mosaic internal scratch.
        fixed = (2 * dim * pad_2d * in_bytes
                 + 2 * 12 * pad_2d * 4
                 + 2 * MIB)
        rows = max(budget_bytes - fixed, per_row) // per_row
        rows = max(W, min(rows, max_rows))
    else:
        rows = max(W, int(tile_rows))
    th = max(1, min(BH, rows // W))
    # Keep several grid steps when BH allows: megacore sharding (v7x) and DMA
    # prefetch/writeback overlap both need >1 iteration per TensorCore.
    aligned_steps = BH // th_align
    if aligned_steps >= 2:
        th = min(th, max(th_align, BH // min(target_steps, aligned_steps)))
    if th >= BH:
        return BH
    th = (th // th_align) * th_align
    if th == 0:
        th = th_align if th_align <= BH else BH
    return th


def _build_call(M, dim, W, th, nb, in_dtype, out_dtype, lane_dense,
                vmem_limit_bytes, cost):
    two_dim = 2 * dim
    tm = th * W
    BH = M // W
    kernel = functools.partial(patch_expand_kernel, lane_dense=lane_dense)
    if lane_dense:
        # (BH, 2*W*dim) in row-major order == final (B, 2H, 2W, dim//2).
        out_shape = jax.ShapeDtypeStruct((BH, 2 * W * dim), out_dtype)
        out_spec = pl.BlockSpec((th, 2 * W * dim), lambda i: (i, 0))
    else:
        # Same row-major order; last dim may be < 128 (masked stores) but this
        # layout is the proven fallback when the lane fold does not lower.
        out_shape = jax.ShapeDtypeStruct((BH, 2, W, dim), out_dtype)
        out_spec = pl.BlockSpec((th, 2, W, dim), lambda i: (i, 0, 0, 0))
    grid_spec = pltpu.PrefetchScalarGridSpec(
        num_scalar_prefetch=0,
        grid=(nb,),
        in_specs=[
            pl.BlockSpec((tm, dim), lambda i: (i, 0)),
            pl.BlockSpec((dim, two_dim), lambda i: (0, 0)),
            pl.BlockSpec((two_dim, 4), lambda i: (0, 0)),
            pl.BlockSpec((4, two_dim), lambda i: (0, 0)),
            pl.BlockSpec((1, two_dim), lambda i: (0, 0)),
            pl.BlockSpec((1, two_dim), lambda i: (0, 0)),
        ],
        out_specs=out_spec,
    )
    return pl.pallas_call(
        kernel,
        out_shape=out_shape,
        grid_spec=grid_spec,
        compiler_params=pltpu.CompilerParams(
            dimension_semantics=("parallel",),
            vmem_limit_bytes=vmem_limit_bytes),
        cost_estimate=cost,
    )


def _lane_dense_supported(M, dim, W, th, nb, in_dtype, out_dtype,
                          vmem_limit_bytes, cost):
    """AOT-compile the lane-dense variant once for this config (cached).

    The in-kernel sublane->lane fold ((th*W, dim) -> (th, W*dim)) is
    shape/layout dependent in Mosaic; if it does not lower we fall back to the
    known-good (BH, 2, W, dim) output layout.  This is a compile-only probe;
    the production call is never wrapped in a try/except.
    """
    global _LAST_PROBE_ERROR
    two_dim = 2 * dim
    args = (
        jax.ShapeDtypeStruct((M, dim), in_dtype),
        jax.ShapeDtypeStruct((dim, two_dim), in_dtype),
        jax.ShapeDtypeStruct((two_dim, 4), jnp.float32),
        jax.ShapeDtypeStruct((4, two_dim), jnp.float32),
        jax.ShapeDtypeStruct((1, two_dim), jnp.float32),
        jax.ShapeDtypeStruct((1, two_dim), jnp.float32),
    )
    call = _build_call(M, dim, W, th, nb, in_dtype, out_dtype, True,
                       vmem_limit_bytes, cost)
    try:
        jax.jit(call).lower(*args).compile()
        return True
    except Exception as e:  # Mosaic lowering/compile failure of the probe only.
        _LAST_PROBE_ERROR = e
        return False


def patch_expand(x, w_expand, ln_gamma, ln_beta, input_resolution, *,
                 tile_rows=None, compute_dtype=None, out_dtype=None,
                 vmem_limit_bytes=None, lane_dense="auto"):
    """Fused PatchExpand forward.

    x: (B, H*W, dim); w_expand: (dim, 2*dim) (= nn.Linear weight transposed);
    ln_gamma/ln_beta: (dim//2,).  Returns (B, 4*H*W, dim//2).

    The kernel is HBM-bandwidth bound: pass compute_dtype=out_dtype=
    jnp.bfloat16 when the surrounding model tolerates it (halves the dominant
    output stream; LayerNorm statistics stay in f32 either way).
    """
    H, W = input_resolution
    B, L, dim = x.shape
    assert L == H * W, "input feature has wrong size"
    assert dim % 2 == 0
    c = dim // 2
    two_dim = 2 * dim
    if out_dtype is None:
        out_dtype = x.dtype
    if compute_dtype is not None:
        x = x.astype(compute_dtype)
    if w_expand.dtype != x.dtype:
        w_expand = w_expand.astype(x.dtype)

    BH = B * H
    M = B * L
    x_flat = x.reshape(M, dim)

    in_b = jnp.dtype(x_flat.dtype).itemsize
    out_b = jnp.dtype(out_dtype).itemsize
    vmem_limit_bytes, budget = _vmem_policy(vmem_limit_bytes)
    th_align = _th_alignment(W, in_b, out_b)
    th = _pick_th(BH, W, dim, in_b, out_b, th_align, budget, tile_rows)
    nb = pl.cdiv(BH, th)

    # LayerNorm params tiled over the 4 (p1, p2) chunks -> full-lane affine.
    gamma4 = jnp.tile(jnp.asarray(ln_gamma, jnp.float32).reshape(1, c), (1, 4))
    beta4 = jnp.tile(jnp.asarray(ln_beta, jnp.float32).reshape(1, c), (1, 4))

    # Segment matrices for per-chunk statistics (chunk = dim//2 lanes).
    chunk_of_col = np.arange(two_dim) // c
    sdown = jnp.asarray(
        (chunk_of_col[:, None] == np.arange(4)[None, :]).astype(np.float32) / c)
    sup = jnp.asarray(
        (np.arange(4)[:, None] == chunk_of_col[None, :]).astype(np.float32))

    cost = pl.CostEstimate(
        flops=int(2 * M * dim * two_dim + 80 * M * dim),
        transcendentals=int(4 * M),
        bytes_accessed=int(M * dim * in_b + dim * two_dim * in_b
                           + M * two_dim * out_b + 20 * two_dim * 4),
    )

    if lane_dense == "auto":
        key = (M, dim, W, th, jnp.dtype(x_flat.dtype).name,
               jnp.dtype(out_dtype).name, int(vmem_limit_bytes))
        use_ld = _VARIANT_CACHE.get(key)
        if use_ld is None:
            use_ld = _lane_dense_supported(M, dim, W, th, nb, x_flat.dtype,
                                           out_dtype, vmem_limit_bytes, cost)
            _VARIANT_CACHE[key] = use_ld
    else:
        use_ld = bool(lane_dense)

    call = _build_call(M, dim, W, th, nb, x_flat.dtype, out_dtype, use_ld,
                       vmem_limit_bytes, cost)
    y4 = call(x_flat, w_expand, sdown, sup, gamma4, beta4)

    # Free reshape (pure row-major re-view) to (B, 4*H*W, dim//2).
    return y4.reshape(B, 4 * H * W, c)


def patch_expand_ref(x, w_expand, ln_gamma, ln_beta, input_resolution):
    """Pure-JAX reference mirroring the PyTorch forward."""
    H, W = input_resolution
    B, L, dim = x.shape
    c = dim // 2
    y = x @ w_expand                                  # (B, L, 2*dim)
    y = y.reshape(B, H, W, 2, 2, c)
    y = jnp.transpose(y, (0, 1, 3, 2, 4, 5)).reshape(B, 4 * H * W, c)
    mu = jnp.mean(y, axis=-1, keepdims=True)
    var = jnp.mean((y - mu) ** 2, axis=-1, keepdims=True)
    return (y - mu) / jnp.sqrt(var + LN_EPS) * ln_gamma + ln_beta


if __name__ == "__main__":
    # Small shapes consistent with the module: B=2, H=W=8, dim=64.
    B, H, W, dim = 2, 8, 8, 64
    key = jax.random.PRNGKey(0)
    kx, kw, kg, kb = jax.random.split(key, 4)

    x = jax.random.normal(kx, (B, H * W, dim), dtype=jnp.float32)
    # nn.Linear(dim, 2*dim, bias=False): weight (2*dim, dim); we store W.T.
    w_expand = jax.random.normal(kw, (dim, 2 * dim), dtype=jnp.float32) * 0.05
    ln_gamma = 1.0 + 0.1 * jax.random.normal(kg, (dim // 2,), dtype=jnp.float32)
    ln_beta = 0.1 * jax.random.normal(kb, (dim // 2,), dtype=jnp.float32)

    ref = jax.block_until_ready(
        patch_expand_ref(x, w_expand, ln_gamma, ln_beta, (H, W)))

    # f32 path (dtype-preserving defaults keep the module's semantics).
    out = jax.block_until_ready(
        patch_expand(x, w_expand, ln_gamma, ln_beta, (H, W)))
    assert out.shape == (B, 4 * H * W, dim // 2), out.shape
    np.testing.assert_allclose(np.asarray(out), np.asarray(ref),
                               rtol=2e-4, atol=2e-4)

    # bf16 fast path (halves the dominant output HBM stream; LN stats in f32).
    out_bf16 = jax.block_until_ready(
        patch_expand(x, w_expand, ln_gamma, ln_beta, (H, W),
                     compute_dtype=jnp.bfloat16, out_dtype=jnp.bfloat16))
    np.testing.assert_allclose(np.asarray(jnp.asarray(out_bf16, jnp.float32)),
                               np.asarray(ref), rtol=5e-2, atol=5e-2)

    print("KERNEL_OK")
</pallas_src>

<mosaic_0001>
module attributes {stable_mosaic.version = 11 : i64} {
  func.func @patch_expand_kernel(%arg0: i32, %arg1: memref<64x64xf32, #tpu.memory_space<vmem>>, %arg2: memref<64x128xf32, #tpu.memory_space<vmem>>, %arg3: memref<128x4xf32, #tpu.memory_space<vmem>>, %arg4: memref<4x128xf32, #tpu.memory_space<vmem>>, %arg5: memref<1x128xf32, #tpu.memory_space<vmem>>, %arg6: memref<1x128xf32, #tpu.memory_space<vmem>>, %arg7: memref<8x2x8x64xf32, #tpu.memory_space<vmem>>) attributes {dimension_semantics = [#tpu.dimension_semantics<parallel>], iteration_bounds = array<i64: 2>, scalar_prefetch = 0 : i64, scratch_operands = 0 : i64, tpu.core_type = #tpu.core_type<tc>, window_params = [{transform_indices = @transform_0, window_bounds = array<i64: 64, 64>}, {pipeline_mode = #tpu.pipeline_mode<synchronous>, transform_indices = @transform_1, window_bounds = array<i64: 64, 128>}, {pipeline_mode = #tpu.pipeline_mode<synchronous>, transform_indices = @transform_2, window_bounds = array<i64: 128, 4>}, {pipeline_mode = #tpu.pipeline_mode<synchronous>, transform_indices = @transform_3, window_bounds = array<i64: 4, 128>}, {pipeline_mode = #tpu.pipeline_mode<synchronous>, transform_indices = @transform_4, window_bounds = array<i64: 1, 128>}, {pipeline_mode = #tpu.pipeline_mode<synchronous>, transform_indices = @transform_5, window_bounds = array<i64: 1, 128>}, {transform_indices = @transform_6, window_bounds = array<i64: 8, 2, 8, 64>}]} {
    %c0 = arith.constant 0 : index
    %c0_0 = arith.constant 0 : index
    %0 = vector.load %arg1[%c0, %c0_0] : memref<64x64xf32, #tpu.memory_space<vmem>>, vector<64x64xf32>
    %c0_1 = arith.constant 0 : index
    %c0_2 = arith.constant 0 : index
    %1 = vector.load %arg2[%c0_1, %c0_2] : memref<64x128xf32, #tpu.memory_space<vmem>>, vector<64x128xf32>
    %cst = arith.constant dense<0.000000e+00> : vector<64x128xf32>
    %2 = tpu.matmul %0, %1, %cst {dimension_numbers = #tpu.dot_dimension_numbers<[1], [0], [0], [1], [0, 0, 1, 1], [], []>} : vector<64x64xf32>, vector<64x128xf32>, vector<64x128xf32> -> vector<64x128xf32>
    %c0_3 = arith.constant 0 : index
    %c0_4 = arith.constant 0 : index
    %3 = vector.load %arg3[%c0_3, %c0_4] : memref<128x4xf32, #tpu.memory_space<vmem>>, vector<128x4xf32>
    %cst_5 = arith.constant dense<0.000000e+00> : vector<64x4xf32>
    %4 = tpu.matmul %2, %3, %cst_5 {dimension_numbers = #tpu.dot_dimension_numbers<[1], [0], [0], [1], [0, 0, 1, 1], [], []>} : vector<64x128xf32>, vector<128x4xf32>, vector<64x4xf32> -> vector<64x4xf32>
    %5 = arith.mulf %2, %2 : vector<64x128xf32>
    %c0_6 = arith.constant 0 : index
    %c0_7 = arith.constant 0 : index
    %6 = vector.load %arg3[%c0_6, %c0_7] : memref<128x4xf32, #tpu.memory_space<vmem>>, vector<128x4xf32>
    %cst_8 = arith.constant dense<0.000000e+00> : vector<64x4xf32>
    %7 = tpu.matmul %5, %6, %cst_8 {dimension_numbers = #tpu.dot_dimension_numbers<[1], [0], [0], [1], [0, 0, 1, 1], [], []>} : vector<64x128xf32>, vector<128x4xf32>, vector<64x4xf32> -> vector<64x4xf32>
    %8 = arith.mulf %4, %4 : vector<64x4xf32>
    %9 = arith.subf %7, %8 : vector<64x4xf32>
    %cst_9 = arith.constant 0.000000e+00 : f32
    %10 = vector.broadcast %cst_9 : f32 to vector<64x4xf32>
    %11 = arith.maximumf %9, %10 : vector<64x4xf32>
    %cst_10 = arith.constant 9.99999974E-6 : f32
    %12 = vector.broadcast %cst_10 : f32 to vector<64x4xf32>
    %13 = arith.addf %11, %12 : vector<64x4xf32>
    %14 = math.rsqrt %13 : vector<64x4xf32>
    %c0_11 = arith.constant 0 : index
    %c0_12 = arith.constant 0 : index
    %15 = vector.load %arg4[%c0_11, %c0_12] : memref<4x128xf32, #tpu.memory_space<vmem>>, vector<4x128xf32>
    %cst_13 = arith.constant dense<0.000000e+00> : vector<64x128xf32>
    %16 = tpu.matmul %4, %15, %cst_13 {dimension_numbers = #tpu.dot_dimension_numbers<[1], [0], [0], [1], [0, 0, 1, 1], [], []>} : vector<64x4xf32>, vector<4x128xf32>, vector<64x128xf32> -> vector<64x128xf32>
    %c0_14 = arith.constant 0 : index
    %c0_15 = arith.constant 0 : index
    %17 = vector.load %arg4[%c0_14, %c0_15] : memref<4x128xf32, #tpu.memory_space<vmem>>, vector<4x128xf32>
    %cst_16 = arith.constant dense<0.000000e+00> : vector<64x128xf32>
    %18 = tpu.matmul %14, %17, %cst_16 {dimension_numbers = #tpu.dot_dimension_numbers<[1], [0], [0], [1], [0, 0, 1, 1], [], []>} : vector<64x4xf32>, vector<4x128xf32>, vector<64x128xf32> -> vector<64x128xf32>
    %19 = arith.subf %2, %16 : vector<64x128xf32>
    %20 = arith.mulf %19, %18 : vector<64x128xf32>
    %c0_17 = arith.constant 0 : index
    %c0_18 = arith.constant 0 : index
    %21 = vector.load %arg5[%c0_17, %c0_18] : memref<1x128xf32, #tpu.memory_space<vmem>>, vector<1x128xf32>
    %22 = vector.broadcast %21 : vector<1x128xf32> to vector<64x128xf32>
    %23 = arith.mulf %20, %22 : vector<64x128xf32>
    %c0_19 = arith.constant 0 : index
    %c0_20 = arith.constant 0 : index
    %24 = vector.load %arg6[%c0_19, %c0_20] : memref<1x128xf32, #tpu.memory_space<vmem>>, vector<1x128xf32>
    %25 = vector.broadcast %24 : vector<1x128xf32> to vector<64x128xf32>
    %26 = arith.addf %23, %25 : vector<64x128xf32>
    %27 = vector.extract_strided_slice %26 {offsets = [0, 0], sizes = [64, 64], strides = [1, 1]} : vector<64x128xf32> to vector<64x64xf32>
    %28 = vector.shape_cast %27 : vector<64x64xf32> to vector<8x1x8x64xf32>
    %c0_21 = arith.constant 0 : index
    %c0_22 = arith.constant 0 : index
    %c0_23 = arith.constant 0 : index
    %c0_24 = arith.constant 0 : index
    %29 = vector.load %arg7[%c0_21, %c0_22, %c0_23, %c0_24] : memref<8x2x8x64xf32, #tpu.memory_space<vmem>>, vector<8x1x8x64xf32>
    tpu.vector_store %arg7[%c0_21, %c0_22, %c0_23, %c0_24], %28 {strides = array<i32>} : memref<8x2x8x64xf32, #tpu.memory_space<vmem>>, vector<8x1x8x64xf32>,
    %30 = vector.extract_strided_slice %26 {offsets = [0, 64], sizes = [64, 64], strides = [1, 1]} : vector<64x128xf32> to vector<64x64xf32>
    %31 = vector.shape_cast %30 : vector<64x64xf32> to vector<8x1x8x64xf32>
    %c0_25 = arith.constant 0 : index
    %c1 = arith.constant 1 : index
    %c0_26 = arith.constant 0 : index
    %c0_27 = arith.constant 0 : index
    %32 = vector.load %arg7[%c0_25, %c1, %c0_26, %c0_27] : memref<8x2x8x64xf32, #tpu.memory_space<vmem>>, vector<8x1x8x64xf32>
    tpu.vector_store %arg7[%c0_25, %c1, %c0_26, %c0_27], %31 {strides = array<i32>} : memref<8x2x8x64xf32, #tpu.memory_space<vmem>>, vector<8x1x8x64xf32>,
    return
  }
  func.func @transform_0(%arg0: i32) -> (i32, i32) {
    %c0_i32 = arith.constant 0 : i32
    %c0_i32_0 = arith.constant 0 : i32
    return %arg0, %c0_i32 : i32, i32
  }
  func.func @transform_1(%arg0: i32) -> (i32, i32) {
    %c0_i32 = arith.constant 0 : i32
    %c0_i32_0 = arith.constant 0 : i32
    %c0_i32_1 = arith.constant 0 : i32
    return %c0_i32, %c0_i32_0 : i32, i32
  }
  func.func @transform_2(%arg0: i32) -> (i32, i32) {
    %c0_i32 = arith.constant 0 : i32
    %c0_i32_0 = arith.constant 0 : i32
    %c0_i32_1 = arith.constant 0 : i32
    return %c0_i32, %c0_i32_0 : i32, i32
  }
  func.func @transform_3(%arg0: i32) -> (i32, i32) {
    %c0_i32 = arith.constant 0 : i32
    %c0_i32_0 = arith.constant 0 : i32
    %c0_i32_1 = arith.constant 0 : i32
    return %c0_i32, %c0_i32_0 : i32, i32
  }
  func.func @transform_4(%arg0: i32) -> (i32, i32) {
    %c0_i32 = arith.constant 0 : i32
    %c0_i32_0 = arith.constant 0 : i32
    %c0_i32_1 = arith.constant 0 : i32
    return %c0_i32, %c0_i32_0 : i32, i32
  }
  func.func @transform_5(%arg0: i32) -> (i32, i32) {
    %c0_i32 = arith.constant 0 : i32
    %c0_i32_0 = arith.constant 0 : i32
    %c0_i32_1 = arith.constant 0 : i32
    return %c0_i32, %c0_i32_0 : i32, i32
  }
  func.func @transform_6(%arg0: i32) -> (i32, i32, i32, i32) {
    %c0_i32 = arith.constant 0 : i32
    %c0_i32_0 = arith.constant 0 : i32
    %c0_i32_1 = arith.constant 0 : i32
    %c0_i32_2 = arith.constant 0 : i32
    return %arg0, %c0_i32, %c0_i32_0, %c0_i32_1 : i32, i32, i32, i32
  }
}

</mosaic_0001>

<bundles_post_ra>
// kernel: tpu_custom_call.1
= control target key start
LH: loop header
LB: loop body
LE: loop exit
PB: predicated region body
PF: predicated region fallthrough
CT: control target
= control target key end

     0   :  { %11 = vsyncpa [#allocation3], 0  ;;  %s1947_s0 = inlined_call_operand.vmem [shape: f32[128,64], index: 0, kind: input, shape index: {}]   ;;  %s1948_s1 = inlined_call_operand.vmem [shape: f32[64,128], index: 1, kind: input, shape index: {}]   ;;  %s1949_s2 = inlined_call_operand.vmem [shape: f32[128,4], index: 2, kind: input, shape index: {}]   ;;  %s1950_s3 = inlined_call_operand.vmem [shape: f32[4,128], index: 3, kind: input, shape index: {}]   ;;  %s1951_s4 = inlined_call_operand.vmem [shape: f32[1,128], index: 4, kind: input, shape index: {}]   ;;  %s1952_s5 = inlined_call_operand.vmem [shape: f32[1,128], index: 5, kind: input, shape index: {}]   ;;  %s1953_s6 = inlined_call_operand.hbm [shape: f32[16,2,8,64], index: 6, kind: output, shape index: {}]  }
   0x1   :  { %13 = vsyncpa [#allocation3 + $0x1], 0  ;;  %s1629_s21 = smov 0   ;;  %s1631_s22 = smov 0  }
   0x2   :  { %s1633_s23 = smov 0   ;;  %s1635_s24 = smov 0  }
   0x3 LB: > { %s1650_s25 = sadd.s32 4294967295, %s1588_s24   ;;  %s1109_s26 = sadd.s32 4294967294, %s1588_s24   ;;  %s1588_s24 = sphi %s1635_s24, %s1959_s24   ;;  %s1584_s23 = sphi %s1633_s23, %s1958_s23   ;;  %s1580_s22 = sphi %s1631_s22, %s1957_s22   ;;  %s1576_s21 = sphi %s1629_s21, %s1956_s21  }
   0x4   : > { %s1654_s27 = sadd.s32 1, %s1588_s24   ;;  %s157_s28 = sadd.s32 1, %s1584_s23 }
   0x5   : > { %s154_s29 = ssub.s32 %s1588_s24, %s1654_s27  ;;  %p167_p0 = scmp.ne.s32.totalorder %s1584_s23, %s1580_s22 }
   0x6   : > { %p155_p1 = scmp.eq.s32.totalorder %s154_s29, 0  ;;  %p168_p2 = scmp.eq.s32.totalorder %s1650_s25, 1 }
   0x7   : > { %p173_p3 = scmp.ne.s32.totalorder %s1580_s22, %s1576_s21  ;;  %p174_p4 = scmp.eq.s32.totalorder %s1109_s26, 1 }
   0x8   : > { %s1665_s30 = scalar_select %p155_p1, %s1584_s23, %s157_s28  }
   0x9   : > { %p1667_p5 = por %p168_p2, %p167_p0  ;;  %p1671_p6 = por %p174_p4, %p173_p3 }
   0xa   : > { %p1112_p7 = scmp.ge.s32.totalorder %s1588_s24, 1  ;;  %p216_p8 = scmp.lt.s32.totalorder %s1588_s24, 3 }
   0xc   : > { %p217_p9 = pnand %p1112_p7, %p216_p8 }
   0xd   : > { %v261_v0 = vld [vmem:[%s1948_s1] sm:$0xff] (!%p217_p9)  ;;  %v262_v1 = vld [vmem:[%s1948_s1 + $0x8] sm:$0xff] (!%p217_p9)  ;;  %v263_v2 = vld [vmem:[%s1948_s1 + $0x10] sm:$0xff] (!%p217_p9)  ;;  %s1114_s15 = sshll.u32 (!%p217_p9), %s1650_s25, 3  ;;  %vm269_vm0 = vcmask (!%p217_p9), 523264   ;;  %vm699_vm1 = vcmask (!%p217_p9), 1043456  }
   0xe   : > { %220 = sbr.rel (%p217_p9) target bundleno = 843 (0x34b), region = 44  ;;  %v1386_v3 = vpack.c.bf16 (!%p217_p9), %v262_v1, %v261_v0  ;;  %v264_v4 = vld [vmem:[%s1948_s1 + $0x18] sm:$0xff] (!%p217_p9)  ;;  %p247_p10 = scmp.lt.s32.totalorder (!%p217_p9), %s1114_s15, 15  ;;  %v265_v6 = vld [vmem:[%s1948_s1 + $0x20] sm:$0xff] (!%p217_p9)  ;;  %v266_v7 = vld [vmem:[%s1948_s1 + $0x28] sm:$0xff] (!%p217_p9)  ;;  %vm674_vm2 = vcmask (!%p217_p9), 31744  }
   0xf   : > { %v1390_v5 = vpack.c.bf16 (!%p217_p9), %v264_v4, %v263_v2  ;;  %v399_v8 = vld [vmem:[%s1949_s2] sm:$0xff] (!%p217_p9)  ;;  %v400_v9 = vld [vmem:[%s1949_s2 + $0x8] sm:$0xff] (!%p217_p9)  ;;  %v401_v10 = vld [vmem:[%s1949_s2 + $0x10] sm:$0xff] (!%p217_p9)  ;;  %v1394_v13 = vpack.c.bf16 (!%p217_p9), %v266_v7, %v265_v6  ;;  %s243_s20 = sand.u32 (!%p217_p9), 1, %s1580_s22   ;;  %s1159_s13 = sshll.u32 (!%p217_p9), %s1650_s25, 11 }
  0x10   : > { %1387 = vmatprep.subr.bf16.mxu0 (!%p217_p9), %v1386_v3  ;;  %v402_v11 = vld [vmem:[%s1949_s2 + $0x18] sm:$0xff] (!%p217_p9)  ;;  %v1402_v12 = vpack.c.bf16 (!%p217_p9), %v400_v9, %v399_v8  ;;  %v403_v15 = vld [vmem:[%s1949_s2 + $0x20] sm:$0xff] (!%p217_p9)  ;;  %v404_v16 = vld [vmem:[%s1949_s2 + $0x28] sm:$0xff] (!%p217_p9)  ;;  %s1113_s29 = sshll.u32 (!%p217_p9), %s243_s20, 7  ;;  %s1898_s18 = scalar_lea.hbm (!%p217_p9), %s1953_s6, %s1159_s13 }
  0x11   : > { %1389 = vmatpush3.bf16.msra.mxu0 (!%p217_p9), %v1386_v3  ;;  %v1406_v14 = vpack.c.bf16 (!%p217_p9), %v402_v11, %v401_v10  ;;  %v267_v17 = vld [vmem:[%s1948_s1 + $0x30] sm:$0xff] (!%p217_p9)  ;;  %v268_v18 = vld [vmem:[%s1948_s1 + $0x38] sm:$0xff] (!%p217_p9)  ;;  %v1410_v20 = vpack.c.bf16 (!%p217_p9), %v404_v16, %v403_v15  ;;  %v407_v25 = vld [vmem:[%s1949_s2 + $0x40] sm:$0xff] (!%p217_p9)  ;;  %s1854_s12 = scalar_lea.vmem (!%p217_p9), [#allocation2], %s1113_s29  ;;  %s1906_s25 = scalar_lea.sflag (!%p217_p9), [#allocation3], %s243_s20 }
  0x12   : > { %1391 = vmatprep.subr.bf16.mxu0 (!%p217_p9), %v1390_v5  ;;  %1403 = vmatprep.subr.bf16.mxu1 (!%p217_p9), %v1402_v12  ;;  %v1398_v21 = vpack.c.bf16 (!%p217_p9), %v268_v18, %v267_v17  ;;  %v405_v22 = vld [vmem:[%s1949_s2 + $0x30] sm:$0xff] (!%p217_p9)  ;;  %v406_v23 = vld [vmem:[%s1949_s2 + $0x38] sm:$0xff] (!%p217_p9)  ;;  %v408_v26 = vld [vmem:[%s1949_s2 + $0x48] sm:$0xff] (!%p217_p9)  ;;  %s1047_s14 = sshll.u32 (!%p217_p9), %s1854_s12, 4  ;;  %s1591_s19 = smov (!%p217_p9), [#allocation2]   ;;  %s1900_s14 = int_to_ptr.vmem [resolvable:$true] %s1047_s14 }
  0x13   : > { %1405 = vmatpush3.bf16.msra.mxu1 (!%p217_p9), %v1402_v12  ;;  %v1414_v24 = vpack.c.bf16 (!%p217_p9), %v406_v23, %v405_v22  ;;  %v1418_v29 = vpack.c.bf16 (!%p217_p9), %v408_v26, %v407_v25  ;;  %v409_v30 = vld [vmem:[%s1949_s2 + $0x50] sm:$0xff] (!%p217_p9)  ;;  %v410_v31 = vld [vmem:[%s1949_s2 + $0x58] sm:$0xff] (!%p217_p9)  ;;  %v411_v35 = vld [vmem:[%s1949_s2 + $0x60] sm:$0xff] (!%p217_p9)  ;;  %s1530_s26 = sshll.u32 (!%p217_p9), %s1591_s19, 4  ;;  %s1531_s26 = int_to_ptr.vmem [resolvable:$false] %s1530_s26 }
  0x14   : > { %1407 = vmatprep.subr.bf16.mxu1 (!%p217_p9), %v1406_v14  ;;  %v1422_v34 = vpack.c.bf16 (!%p217_p9), %v410_v31, %v409_v30  ;;  %v412_v36 = vld [vmem:[%s1949_s2 + $0x68] sm:$0xff] (!%p217_p9)  ;;  %v413_v40 = vld [vmem:[%s1949_s2 + $0x70] sm:$0xff] (!%p217_p9)  ;;  %v414_v41 = vld [vmem:[%s1949_s2 + $0x78] sm:$0xff] (!%p217_p9)  ;;  %s1532_s28 = scalar_lea.vmem (!%p217_p9), %s1531_s26, 4096  ;;  %p1533_p0 = scmp.lt.s32.totalorder (!%p217_p9), %s1900_s14, %s1531_s26 }
  0x15   : > { %s1961_s15 = smov (!%p247_p10, %s1114_s15), 15  ;;  %1393 = vmatpush3.bf16.msra.mxu0 %v1390_v5  ;;  %v1426_v39 = vpack.c.bf16 %v412_v36, %v411_v35  ;;  %v1430_v43 = vpack.c.bf16 %v414_v41, %v413_v40  ;;  %v673_v60 = vld [vmem:[%s1950_s3] sm:$0xf] }
  0x16   : > { %s1115_s16 = sshll.u32 %s1961_s15, 3  ;;  %1395 = vmatprep.subr.bf16.mxu0 %v1394_v13  ;;  %s1590_s15 = smov 64  }
  0x17   : > { %s1723_s11 = scalar_lea.vmem %s1947_s0, %s1115_s16  ;;  %1409 = vmatpush3.bf16.msra.mxu1 %v1406_v14 }
  0x18   : > { %v253_v19 = vld [vmem:[%s1723_s11] sm:$0xff]  ;;  %1411 = vmatprep.subr.bf16.mxu1 %v1410_v20  ;;  %v254_v27 = vld [vmem:[%s1723_s11 + $0x8] sm:$0xff]  ;;  %v255_v28 = vld [vmem:[%s1723_s11 + $0x10] sm:$0xff] }
  0x19   : > { %1258 = vmatprep.mubr.msk.f32.mxu0 %vm269_vm0, %v253_v19  ;;  %1397 = vmatpush3.bf16.msra.mxu0 %v1394_v13  ;;  %v256_v32 = vld [vmem:[%s1723_s11 + $0x18] sm:$0xff]  ;;  %v257_v33 = vld [vmem:[%s1723_s11 + $0x20] sm:$0xff]  ;;  %v258_v37 = vld [vmem:[%s1723_s11 + $0x28] sm:$0xff] }
  0x1a   : > { %1399 = vmatprep.subr.bf16.mxu0 %v1398_v21  ;;  %v259_v38 = vld [vmem:[%s1723_s11 + $0x30] sm:$0xff]  ;;  %v260_v42 = vld [vmem:[%s1723_s11 + $0x38] sm:$0xff]  ;;  %s1526_s11 = scalar_lea.vmem %s1900_s14, 2048 }
  0x1b   : > { %1413 = vmatpush3.bf16.msra.mxu1 %v1410_v20  ;;  %p1527_p11 = scmp.ne.s32.totalorder %s1900_s14, %s1526_s11  ;;  %p1534_p1 = scmp.lt.s32.totalorder %s1532_s28, %s1526_s11 }
  0x1c   : > { %1415 = vmatprep.subr.bf16.mxu1 %v1414_v24 }
  0x1d   : > { %1401 = vmatpush3.bf16.msra.mxu0 %v1398_v21  ;;  %p1528_p12 = pnand %p1527_p11, %p1667_p5  ;;  %p1535_p2 = por %p1534_p1, %p1533_p0 }
  0x1e   : > { %1435 = vmatprep.subr.bf16.mxu0 %v1402_v12 }
  0x1f   : > { %1417 = vmatpush3.bf16.msra.mxu1 %v1414_v24  ;;  %p1529_p13 = pneg %p1528_p12 }
  0x20   : > { %1259 = vmatmul.mubr.msk.f32.vlgmr.msra.gmra.mrb[0].mxu0 %vm269_vm0, %v254_v27  ;;  %1419 = vmatprep.subr.bf16.mxu1 %v1418_v29 }
  0x21   : > { %1261 = vmatprep.mubr.msk.f32.mxu0 %vm269_vm0, %v255_v28  ;;  %1437 = vmatpush3.bf16.msra.mxu0 %v1402_v12  ;;  %p1536_p3 = pnand %p1535_p2, %p1529_p13 }
  0x22   : > { %1439 = vmatprep.subr.bf16.mxu0 %v1406_v14 }
  0x23   : > { %1421 = vmatpush3.bf16.msra.mxu1 %v1418_v29 }
  0x24   : > { %1262 = vmatmul.mubr.msk.f32.gmra.mrb[2].mxu0 %vm269_vm0, %v256_v32  ;;  %1423 = vmatprep.subr.bf16.mxu1 %v1422_v34 }
  0x25   : > { %1264 = vmatprep.mubr.msk.f32.mxu0 %vm269_vm0, %v257_v33  ;;  %1441 = vmatpush3.bf16.msra.mxu0 %v1406_v14 }
  0x26   : > { %1443 = vmatprep.subr.bf16.mxu0 %v1410_v20 }
  0x27   : > { %1425 = vmatpush3.bf16.msra.mxu1 %v1422_v34 }
  0x28   : > { %1265 = vmatmul.mubr.msk.f32.gmra.mrb[4].mxu0 %vm269_vm0, %v258_v37  ;;  %1427 = vmatprep.subr.bf16.mxu1 %v1426_v39 }
  0x29   : > { %1267 = vmatprep.mubr.msk.f32.mxu0 %vm269_vm0, %v259_v38  ;;  %1445 = vmatpush3.bf16.msra.mxu0 %v1410_v20 }
  0x2a   : > { %1447 = vmatprep.subr.bf16.mxu0 %v1414_v24 }
  0x2b   : > { %1429 = vmatpush3.bf16.msra.mxu1 %v1426_v39 }
  0x2c   : > { %1268 = vmatmul.mubr.msk.f32.gmra.mrb[6].mxu0 %vm269_vm0, %v260_v42  ;;  %1431 = vmatprep.subr.bf16.mxu1 %v1430_v43 }
  0x2d   : > { %1449 = vmatpush3.bf16.msra.mxu0 %v1414_v24 }
  0x2e   : > { %1451 = vmatprep.subr.bf16.mxu0 %v1418_v29 }
  0x2f   : > { %1433 = vmatpush3.bf16.msra.mxu1 %v1430_v43 }
  0x30   : > { %1358 = vmatprep.subr.msk.mxu1 %vm699_vm1, %v673_v60 }
  0x31   : > { %1453 = vmatpush3.bf16.msra.mxu0 %v1418_v29 }
  0x32   : > { %1455 = vmatprep.subr.bf16.mxu0 %v1422_v34 }
  0x35   : > { %1457 = vmatpush3.bf16.msra.mxu0 %v1422_v34 }
  0x36   : > { %1459 = vmatprep.subr.bf16.mxu0 %v1426_v39 }
  0x39   : > { %1461 = vmatpush3.bf16.msra.mxu0 %v1426_v39 }
  0x3a   : > { %1463 = vmatprep.subr.bf16.mxu0 %v1430_v43 }
  0x3d   : > { %1465 = vmatpush3.bf16.msra.mxu0 %v1430_v43 }
  0x3e   : > { %1372 = vmatprep.subr.msk.mxu0 %vm699_vm1, %v673_v60 }
  0xf3   : > { %v1771_v44 = vpop.f32.mrb[0].mxu0 }
  0xf4   : > { %v1773_v45 = vpop.f32.mrb[1].mxu0  ;;  %v521_v47 = vmul.f32 %v1771_v44, %v1771_v44 }
  0xf5   : > { %v520_v46 = vmul.f32 %v1773_v45, %v1773_v45  ;;  %1302 = vmatprep.mubr.f32.mxu1 %v1773_v45 }
  0xf6   : > { %1303 = vmatmul.mubr.f32.vlgmr.msra.gmra.mrb[0].mxu1 %v1771_v44 }
  0xf7   : > { %v1781_v48 = vpop.f32.mrb[2].mxu0  ;;  %1346 = vmatprep.mubr.f32.mxu0 %v520_v46  ;;  %1359 = vmatpush3.msk.msra.mxu1 %vm699_vm1, %v673_v60 }
  0xf8   : > { %v1783_v49 = vpop.f32.mrb[3].mxu0  ;;  %1347 = vmatmul.mubr.f32.vlgmr.msra.gmra.mrb[8].mxu0 %v521_v47  ;;  %v523_v51 = vmul.f32 %v1781_v48, %v1781_v48  ;;  %1466 = vmatprep.subr.msk.mxu1 %vm699_vm1, %v673_v60 }
  0xf9   : > { %v522_v50 = vmul.f32 %v1783_v49, %v1783_v49  ;;  %1305 = vmatprep.mubr.f32.mxu1 %v1783_v49  ;;  %1373 = vmatpush3.msk.msra.mxu0 %vm699_vm1, %v673_v60 }
  0xfa   : > { %1306 = vmatmul.mubr.f32.gmra.mrb[2].mxu1 %v1781_v48 }
  0xfb   : > { %v1791_v52 = vpop.f32.mrb[4].mxu0  ;;  %1349 = vmatprep.mubr.f32.mxu0 %v522_v50 }
  0xfc   : > { %v525_v53 = vmul.f32 %v1791_v52, %v1791_v52  ;;  %v1795_v54 = vpop.f32.mrb[5].mxu0  ;;  %1350 = vmatmul.mubr.f32.gmra.mrb[10].mxu0 %v523_v51 }
  0xfd   : > { %v524_v55 = vmul.f32 %v1795_v54, %v1795_v54  ;;  %1308 = vmatprep.mubr.f32.mxu1 %v1795_v54 }
  0xfe   : > { %1309 = vmatmul.mubr.f32.gmra.mrb[4].mxu1 %v1791_v52 }
  0xff   : > { %v1801_v56 = vpop.f32.mrb[6].mxu0  ;;  %1352 = vmatprep.mubr.f32.mxu0 %v524_v55 }
 0x100   : > { %v527_v57 = vmul.f32 %v1801_v56, %v1801_v56  ;;  %v1805_v58 = vpop.f32.mrb[7].mxu0  ;;  %1353 = vmatmul.mubr.f32.gmra.mrb[12].mxu0 %v525_v53 }
 0x101   : > { %v526_v59 = vmul.f32 %v1805_v58, %v1805_v58  ;;  %1311 = vmatprep.mubr.f32.mxu1 %v1805_v58 }
 0x102   : > { %1312 = vmatmul.mubr.f32.gmra.mrb[6].mxu1 %v1801_v56 }
 0x103   : > { %1355 = vmatprep.mubr.f32.mxu0 %v526_v59 }
 0x104   : > { %1356 = vmatmul.mubr.f32.gmra.mrb[14].mxu0 %v527_v57 }
 0x1c9   : > { %v1304_v61 = vpop.f32.mrb[0].mxu1 }
 0x1ca   : > { %v634_v62 = vmul.f32 %v1304_v61, %v1304_v61  ;;  %v481_v63 = vpop.f32.mrb[1].mxu1 }
 0x1cb   : > { %v633_v0 = vmul.f32 %v481_v63, %v481_v63  ;;  %v1348_v1 = vpop.f32.mrb[8].mxu0  ;;  %1360 = vmatprep.mubr.msk.f32.mxu1 %vm674_vm2, %v481_v63 }
 0x1cc   : > { %v642_v2 = vsub.f32 %v1348_v1, %v634_v62  ;;  %v594_v3 = vpop.f32.mrb[9].mxu0  ;;  %1361 = vmatmul.mubr.msk.f32.vlgmr.msra.gmra.mrb[8].mxu1 %vm674_vm2, %v1304_v61 }
 0x1cd   : > { %v641_v4 = vsub.f32 %v594_v3, %v633_v0  ;;  %v1307_v5 = vpop.f32.mrb[2].mxu1  ;;  %1467 = vmatpush3.msk.msra.mxu1 %vm699_vm1, %v673_v60 }
 0x1ce   : > { %v650_v6 = vmax.f32 %v642_v2, 0.0  ;;  %v636_v7 = vmul.f32 %v1307_v5, %v1307_v5  ;;  %v491_v8 = vpop.f32.mrb[3].mxu1 }
 0x1cf   : > { %v649_v9 = vmax.f32 %v641_v4, 0.0  ;;  %v635_v10 = vmul.f32 %v491_v8, %v491_v8  ;;  %v1351_v11 = vpop.f32.mrb[10].mxu0  ;;  %1363 = vmatprep.mubr.msk.f32.mxu1 %vm674_vm2, %v491_v8 }
 0x1d0   : > { %v658_v12 = vadd.f32 1e-05, %v650_v6  ;;  %v644_v13 = vsub.f32 %v1351_v11, %v636_v7  ;;  %v604_v14 = vpop.f32.mrb[11].mxu0  ;;  %1364 = vmatmul.mubr.msk.f32.gmra.mrb[10].mxu1 %vm674_vm2, %v1307_v5 }
 0x1d1   : > { %v657_v15 = vadd.f32 1e-05, %v649_v9  ;;  %v643_v16 = vsub.f32 %v604_v14, %v635_v10  ;;  %v1310_v17 = vpop.f32.mrb[4].mxu1 }
 0x1d2   : > { %v652_v18 = vmax.f32 %v644_v13, 0.0  ;;  %v638_v19 = vmul.f32 %v1310_v17, %v1310_v17  ;;  %v501_v20 = vpop.f32.mrb[5].mxu1 }
 0x1d3   : > { %1510 = vrsqrt.f32 %v657_v15  ;;  %v651_v21 = vmax.f32 %v643_v16, 0.0  ;;  %v637_v22 = vmul.f32 %v501_v20, %v501_v20  ;;  %v1354_v23 = vpop.f32.mrb[12].mxu0  ;;  %1366 = vmatprep.mubr.msk.f32.mxu1 %vm674_vm2, %v501_v20 }
 0x1d4   : > { %1512 = vrsqrt.f32 %v658_v12  ;;  %v660_v24 = vadd.f32 1e-05, %v652_v18  ;;  %v646_v25 = vsub.f32 %v1354_v23, %v638_v19  ;;  %v614_v26 = vpop.f32.mrb[13].mxu0  ;;  %1367 = vmatmul.mubr.msk.f32.gmra.mrb[12].mxu1 %vm674_vm2, %v1310_v17 }
 0x1d5   : > { %v659_v27 = vadd.f32 1e-05, %v651_v21  ;;  %v645_v28 = vsub.f32 %v614_v26, %v637_v22  ;;  %v1313_v29 = vpop.f32.mrb[6].mxu1 }
 0x1d6   : > { %v654_v30 = vmax.f32 %v646_v25, 0.0  ;;  %v640_v31 = vmul.f32 %v1313_v29, %v1313_v29  ;;  %v511_v32 = vpop.f32.mrb[7].mxu1 }
 0x1d7   : > { %1514 = vrsqrt.f32 %v659_v27  ;;  %v653_v33 = vmax.f32 %v645_v28, 0.0  ;;  %v639_v34 = vmul.f32 %v511_v32, %v511_v32  ;;  %v1357_v35 = vpop.f32.mrb[14].mxu0  ;;  %1369 = vmatprep.mubr.msk.f32.mxu1 %vm674_vm2, %v511_v32 }
 0x1d8   : > { %1516 = vrsqrt.f32 %v660_v24  ;;  %v662_v36 = vadd.f32 1e-05, %v654_v30  ;;  %v648_v37 = vsub.f32 %v1357_v35, %v640_v31  ;;  %v624_v38 = vpop.f32.mrb[15].mxu0  ;;  %1370 = vmatmul.mubr.msk.f32.gmra.mrb[14].mxu1 %vm674_vm2, %v1313_v29 }
 0x1d9   : > { %v661_v39 = vadd.f32 1e-05, %v653_v33  ;;  %v647_v40 = vsub.f32 %v624_v38, %v639_v34 }
 0x1da   : > { %1518 = vrsqrt.f32 %v662_v36  ;;  %v656_v41 = vmax.f32 %v648_v37, 0.0 }
 0x1db   : > { %1520 = vrsqrt.f32 %v661_v39  ;;  %v655_v42 = vmax.f32 %v647_v40, 0.0 }
 0x1dc   : > { %v664_v43 = vadd.f32 1e-05, %v656_v41 }
 0x1dd   : > { %v1511_v46 = vpop.eup %1510  ;;  %v663_v47 = vadd.f32 1e-05, %v655_v42 }
 0x1de   : > { %v1513_v50 = vpop.eup %1512  ;;  %1522 = vrsqrt.f32 %v664_v43  ;;  %1374 = vmatprep.mubr.msk.f32.mxu0 %vm674_vm2, %v1511_v46 }
 0x1df   : > { %1524 = vrsqrt.f32 %v663_v47  ;;  %1375 = vmatmul.mubr.msk.f32.vlgmr.msra.gmra.mrb[16].mxu0 %vm674_vm2, %v1513_v50 }
 0x1e1   : > { %v1515_v51 = vpop.eup %1514 }
 0x1e2   : > { %v1517_v53 = vpop.eup %1516  ;;  %1377 = vmatprep.mubr.msk.f32.mxu0 %vm674_vm2, %v1515_v51 }
 0x1e3   : > { %1378 = vmatmul.mubr.msk.f32.gmra.mrb[18].mxu0 %vm674_vm2, %v1517_v53 }
 0x1e4   : > { %v1519_v55 = vpop.eup %1518 }
 0x1e5   : > { %v1521_v57 = vpop.eup %1520 }
 0x1e6   : > { %1380 = vmatprep.mubr.msk.f32.mxu1 %vm674_vm2, %v1521_v57 }
 0x1e7   : > { %1381 = vmatmul.mubr.msk.f32.vlgmr.msra.gmra.mrb[16].mxu1 %vm674_vm2, %v1519_v55 }
 0x1e8   : > { %v1523_v59 = vpop.eup %1522 }
 0x1e9   : > { %v1525_v60 = vpop.eup %1524 }
 0x1ea   : > { %1383 = vmatprep.mubr.msk.f32.mxu1 %vm674_vm2, %v1525_v60 }
 0x1eb   : > { %1384 = vmatmul.mubr.msk.f32.gmra.mrb[18].mxu1 %vm674_vm2, %v1523_v59 }
 0x29f   : > { %v1362_v61 = vpop.f32.mrb[8].mxu1 }
 0x2a0   : > { %v938_v62 = vsub.f32 %v1771_v44, %v1362_v61  ;;  %v769_v63 = vpop.f32.mrb[9].mxu1 }
 0x2a1   : > { %v937_v0 = vsub.f32 %v1773_v45, %v769_v63 }
 0x2a3   : > { %v1365_v1 = vpop.f32.mrb[10].mxu1 }
 0x2a4   : > { %v940_v2 = vsub.f32 %v1781_v48, %v1365_v1  ;;  %v779_v3 = vpop.f32.mrb[11].mxu1  ;;  %v1142_v48 = vld [vmem:[%s1951_s4] ss:$0 sm:$0xff] }
 0x2a5   : > { %v939_v4 = vsub.f32 %v1783_v49, %v779_v3 }
 0x2a7   : > { %v1368_v5 = vpop.f32.mrb[12].mxu1 }
 0x2a8   : > { %v942_v6 = vsub.f32 %v1791_v52, %v1368_v5  ;;  %v789_v7 = vpop.f32.mrb[13].mxu1 }
 0x2a9   : > { %v941_v8 = vsub.f32 %v1795_v54, %v789_v7  ;;  %v1143_v54 = vld [vmem:[%s1952_s5] ss:$0 sm:$0xff] }
 0x2ab   : > { %v1371_v9 = vpop.f32.mrb[14].mxu1 }
 0x2ac   : > { %v944_v10 = vsub.f32 %v1801_v56, %v1371_v9  ;;  %v799_v44 = vpop.f32.mrb[15].mxu1 }
 0x2ad   : > { %v943_v11 = vsub.f32 %v1805_v58, %v799_v44 }
 0x2b2   : > { %v1376_v45 = vpop.f32.mrb[16].mxu0 }
 0x2b3   : > { %v946_v12 = vmul.f32 %v1376_v45, %v938_v62  ;;  %v898_v49 = vpop.f32.mrb[17].mxu0 }
 0x2b4   : > { %v945_v52 = vmul.f32 %v937_v0, %v898_v49 }
 0x2b5   : > { %v961_v13 = vmul.f32 %v1142_v48, %v946_v12 }
 0x2b6   : > { %v960_v56 = vmul.f32 %v1142_v48, %v945_v52  ;;  %v1379_v14 = vpop.f32.mrb[18].mxu0 }
 0x2b7   : > { %v948_v15 = vmul.f32 %v1379_v14, %v940_v2  ;;  %v908_v58 = vpop.f32.mrb[19].mxu0  ;;  %v976_v16 = vadd.f32 %v1143_v54, %v961_v13 }
 0x2b8   : > { %v947_v17 = vmul.f32 %v939_v4, %v908_v58  ;;  %v975_v18 = vadd.f32 %v1143_v54, %v960_v56 }
 0x2b9   : > { %v963_v19 = vmul.f32 %v1142_v48, %v948_v15  ;;  %1001 = vrot.lane.b32.xlu0 %v976_v16, %s1590_s15  ;;  %984 = vst.msk [vmem:[%s1854_s12 + $0x10] sm:$0xff] %vm269_vm0, %v976_v16 }
 0x2ba   : > { %v962_v20 = vmul.f32 %v1142_v48, %v947_v17  ;;  %v1382_v21 = vpop.f32.mrb[16].mxu1  ;;  %983 = vst.msk [vmem:[%s1854_s12] sm:$0xff] %vm269_vm0, %v975_v18 }
 0x2bb   : > { %v950_v22 = vmul.f32 %v1382_v21, %v942_v6  ;;  %v918_v23 = vpop.f32.mrb[17].mxu1  ;;  %v978_v24 = vadd.f32 %v1143_v54, %v963_v19 }
 0x2bc   : > { %v949_v25 = vmul.f32 %v941_v8, %v918_v23  ;;  %v977_v26 = vadd.f32 %v1143_v54, %v962_v20 }
 0x2bd   : > { %v965_v27 = vmul.f32 %v1142_v48, %v950_v22  ;;  %999 = vrot.lane.b32.xlu0 %v975_v18, %s1590_s15  ;;  %1005 = vrot.lane.b32.xlu1 %v978_v24, %s1590_s15  ;;  %986 = vst.msk [vmem:[%s1854_s12 + $0x30] sm:$0xff] %vm269_vm0, %v978_v24 }
 0x2be   : > { %v964_v28 = vmul.f32 %v1142_v48, %v949_v25  ;;  %v1385_v29 = vpop.f32.mrb[18].mxu1  ;;  %985 = vst.msk [vmem:[%s1854_s12 + $0x20] sm:$0xff] %vm269_vm0, %v977_v26 }
 0x2bf   : > { %v952_v30 = vmul.f32 %v1385_v29, %v944_v10  ;;  %v928_v31 = vpop.f32.mrb[19].mxu1  ;;  %v980_v32 = vadd.f32 %v1143_v54, %v965_v27 }
 0x2c0   : > { %v951_v33 = vmul.f32 %v943_v11, %v928_v31  ;;  %v979_v34 = vadd.f32 %v1143_v54, %v964_v28 }
 0x2c1   : > { %v967_v35 = vmul.f32 %v1142_v48, %v952_v30  ;;  %1003 = vrot.lane.b32.xlu1 %v977_v26, %s1590_s15  ;;  %988 = vst.msk [vmem:[%s1854_s12 + $0x50] sm:$0xff] %vm269_vm0, %v980_v32 }
 0x2c2   : > { %v966_v36 = vmul.f32 %v1142_v48, %v951_v33  ;;  %1007 = vrot.lane.b32.xlu0 %v979_v34, %s1590_s15  ;;  %987 = vst.msk [vmem:[%s1854_s12 + $0x40] sm:$0xff] %vm269_vm0, %v979_v34 }
 0x2c3   : > { %v982_v37 = vadd.f32 %v1143_v54, %v967_v35 }
 0x2c4   : > { %v981_v38 = vadd.f32 %v1143_v54, %v966_v36 }
 0x2c5   : > { %1009 = vrot.lane.b32.xlu1 %v980_v32, %s1590_s15  ;;  %990 = vst.msk [vmem:[%s1854_s12 + $0x70] sm:$0xff] %vm269_vm0, %v982_v37 }
 0x2c6   : > { %1011 = vrot.lane.b32.xlu0 %v981_v38, %s1590_s15  ;;  %989 = vst.msk [vmem:[%s1854_s12 + $0x60] sm:$0xff] %vm269_vm0, %v981_v38 }
 0x2c9   : > { %1013 = vrot.lane.b32.xlu1 %v982_v37, %s1590_s15 }
 0x32b   : > { %v1002_v39 = vpop.permute.xlu0 %1001 }
 0x32c   : > { %1145 = vst.msk [vmem:[%s1854_s12 + $0x18] sm:$0xff] %vm269_vm0, %v1002_v39 }
 0x32f   : > { %v1000_v40 = vpop.permute.xlu0 %999  ;;  %v1006_v41 = vpop.permute.xlu1 %1005 }
 0x330   : > { %1144 = vst.msk [vmem:[%s1854_s12 + $0x8] sm:$0xff] %vm269_vm0, %v1000_v40  ;;  %1147 = vst.msk [vmem:[%s1854_s12 + $0x38] sm:$0xff] %vm269_vm0, %v1006_v41 }
 0x333   : > { %v1004_v42 = vpop.permute.xlu1 %1003 }
 0x334   : > { %1146 = vst.msk [vmem:[%s1854_s12 + $0x28] sm:$0xff] %vm269_vm0, %v1004_v42  ;;  %v1008_v43 = vpop.permute.xlu0 %1007 }
 0x335   : > { %1148 = vst.msk [vmem:[%s1854_s12 + $0x48] sm:$0xff] %vm269_vm0, %v1008_v43 }
 0x337   : > { %v1010_v46 = vpop.permute.xlu1 %1009 }
 0x338   : > { %1149 = vst.msk [vmem:[%s1854_s12 + $0x58] sm:$0xff] %vm269_vm0, %v1010_v46  ;;  %v1012_v47 = vpop.permute.xlu0 %1011 }
 0x339   : > { %1150 = vst.msk [vmem:[%s1854_s12 + $0x68] sm:$0xff] %vm269_vm0, %v1012_v47 }
 0x33b   : > { %v1014_v50 = vpop.permute.xlu1 %1013 }
 0x33c   : > { %1151 = vst.msk [vmem:[%s1854_s12 + $0x78] sm:$0xff] %vm269_vm0, %v1014_v50 }
 0x33d   : > { %1539 = shalt.err (!%p1536_p3)
}
 0x33e   : > { %s1540_s20 = scalar_lea.hbm %s1898_s18, 2048  ;;  %s1544_s10 = scalar_lea.hbm %s1953_s6, 4096 }
 0x33f   : > { %p1541_p4 = scmp.ne.s32.totalorder %s1898_s18, %s1540_s20  ;;  %p1545_p9 = scmp.lt.u32.totalorder %s1898_s18, %s1953_s6 }
 0x340   : > { %p1546_p10 = scmp.lt.u32.totalorder %s1544_s10, %s1540_s20  ;;  %p1548_p12 = scmp.lt.u32.totalorder %s1540_s20, %s1898_s18 }
 0x341   : > { %p1542_p7 = pnand %p1541_p4, %p1667_p5 }
 0x342   : > { %p1547_p11 = por %p1546_p10, %p1545_p9 }
 0x343   : > { %p1543_p8 = pneg %p1542_p7 }
 0x344   : > { %p1549_p13 = por %p1548_p12, %p1547_p11 }
 0x346   : > { %p1550_p0 = pnand %p1549_p13, %p1543_p8 }
 0x348   : > { %1553 = shalt.err (!%p1550_p0)
}
 0x349   : > { %s1592_s13 = smov 128   ;;  %s1593_s16 = smov 8  }
 0x34a   : > { %1468 = dma.vmem_to_hbm [thread:$0]  (%p1667_p5), %s1900_s14, 2048, %s1898_s18, %s1906_s25, %s1592_s13, %s1592_s13, %s1593_s16  }
 0x34b PF: > { %p1474_p1 = scmp.ge.s32.totalorder %s1588_s24, 2  ;;  %s1062_s17 = sand.u32 1, %s1576_s21  }
 0x34c   : > { %s1063_s11 = scalar_lea.sflag [#allocation3], %s1062_s17 }
 0x34d   : > { %p1471_p2 = pnand %p1474_p1, %p1671_p6 }
 0x34f   : > { %1571 = dma.done.wait (!%p1471_p2), %s1063_s11, 2048  }
 0x350   : > { %1573 = vsyncadd (!%p1471_p2), %s1063_s11, 4294965248  ;;  %p16_p3 = scmp.ge.s32.totalorder %s1654_s27, 4   ;;  %s1956_s21 = smov %s1580_s22 }
 0x351   : > { %s1957_s22 = smov %s1584_s23  ;;  %s1958_s23 = smov %s1665_s30 }
 0x352   : > { %s1959_s24 = smov %s1654_s27  ;;  %18 = sbr.rel (!%p16_p3) target bundleno = 3 (0x3), region = 80 }
 0x359   :  { %1068 = vsyncpa [#allocation3], 1 }
 0x35a   :  { %1070 = vsyncpa [#allocation3 + $0x1], 1 }

</bundles_post_ra>
